<compile_context>
chip_gen: v6e
topology: v6e:2x2x1
jax: 0.10.0
libtpu: 0.0.40
codegen_flags: <defaults>
</compile_context>

<pallas_src>
import numpy as np
import jax
import jax.numpy as jnp
from jax.experimental import pallas as pl
from jax.experimental.pallas import tpu as pltpu

_INV_SQRT2 = 0.7071067811865476


def _gelu(x):
    # exact (erf-based) GELU, matching torch.nn.GELU() default
    return 0.5 * x * (1.0 + jax.lax.erf(x * _INV_SQRT2))


def elgca_forward(x, params, heads=4):
    B, C, H, W = x.shape
    C2, C4 = C // 2, C // 4
    Cout = C4 * heads
    N = H * W
    assert heads >= 4
    assert H % 2 == 0 and W % 2 == 0, "pooling path assumes even H, W"
    # Lane-dense design invariants (aligned unmasked stores, whole-vreg slices).
    assert N % 128 == 0, "H*W must be a multiple of 128 (pad spatially upstream)"
    assert C2 % 8 == 0, "dim/2 must be a multiple of 8"

    pow2 = ((W & (W - 1)) == 0) and ((H & (H - 1)) == 0)
    log2w = W.bit_length() - 1

    # ---- glue: lane-dense repack (row-major reshapes only, no pad/copy) ----
    x1f = x[:, :C2].reshape(B * C2, N)        # (B*C2, N)
    x2f = x[:, C2:].reshape(B * C2, N)        # (B*C2, N)
    dww = params["dw_w"].reshape(C2, 9).T.reshape(9, C2, 1)
    dwb = params["dw_b"].reshape(C2, 1)
    qw = params["q_w"].reshape(Cout, C2)
    qb = params["q_b"].reshape(Cout, 1)

    def shift_read(v, s):
        """y[..., i] = v[..., (i + s) % N] (cyclic lane shift on the XLU)."""
        sh = (-s) % N
        return v if sh == 0 else pltpu.roll(v, sh, 1)

    def kernel(x1_ref, x2_ref, dww_ref, dwb_ref, qw_ref, qb_ref, out_ref):
        x1 = x1_ref[...]                      # (C2, N)
        x2 = x2_ref[...]                      # (C2, N)

        # Hoisted per-lane coordinates + boundary masks (shared by the
        # depthwise conv and the pooling taps; both slabs are (C2, N)).
        lane = jax.lax.broadcasted_iota(jnp.int32, (C2, N), 1)
        if pow2:
            w_id = lane & (W - 1)
            h_id = lane >> log2w
            anchor = ((h_id & 1) == 0) & ((w_id & 1) == 0)
        else:
            w_id = lane % W
            h_id = lane // W
            anchor = ((h_id % 2) == 0) & ((w_id % 2) == 0)
        not_l = w_id != 0
        not_r = w_id != (W - 1)
        not_t = h_id != 0
        not_b = h_id != (H - 1)

        def tap_mask(dh, dw):
            m = None
            if dw < 0:
                m = not_l
            elif dw > 0:
                m = not_r
            if dh < 0:
                m = not_t if m is None else (m & not_t)
            elif dh > 0:
                m = not_b if m is None else (m & not_b)
            return m

        # --- local branch: depthwise 3x3 conv (bias folded into init) + GELU ---
        acc = jnp.broadcast_to(dwb_ref[...], (C2, N)).astype(jnp.float32)
        for di in range(3):
            for dj in range(3):
                dh, dw = di - 1, dj - 1
                tap = shift_read(x1, dh * W + dw)
                m = tap_mask(dh, dw)
                if m is not None:
                    tap = jnp.where(m, tap, 0.0)
                acc = acc + tap * dww_ref[di * 3 + dj]      # (C2,1) broadcast
        x1g = _gelu(acc)                                    # (C2, N)

        # --- global branch: 1x1 conv = one (Cout,C2)@(C2,N) MXU matmul + GELU ---
        y = jnp.dot(qw_ref[...], x2, preferred_element_type=jnp.float32)
        y = _gelu(y + qb_ref[...])                          # (Cout, N)

        if heads == 4:
            qk_stack = y[0:2 * C4]                          # [q | k], adjacent rows
        else:
            q_sum = y[0:C4]
            for hh in range(1, heads - 3):
                q_sum = q_sum + y[hh * C4:(hh + 1) * C4]
            qk_stack = jnp.concatenate(
                [q_sum, y[(heads - 3) * C4:(heads - 2) * C4]], axis=0)
        v = y[(heads - 2) * C4:(heads - 1) * C4]            # (C4, N)
        lf = y[(heads - 1) * C4:heads * C4]                 # (C4, N)

        # Shared pooling rolls on the stacked (q|k) slab:
        #   AvgPool2d(3, s=2, p=1) -> masked 3x3 box sum / 9, valid only on the
        #   stride-2 "anchor" lanes (even h, even w), zeroed elsewhere.
        #   MaxPool2d(2, s=2)      -> max of taps {0, 1, W, W+1} on the k half.
        box = jnp.zeros((2 * C4, N), jnp.float32)
        kmax = qk_stack[C4:]
        for dh in (-1, 0, 1):
            for dw in (-1, 0, 1):
                tap = shift_read(qk_stack, dh * W + dw)
                m = tap_mask(dh, dw)
                box = box + (tap if m is None else jnp.where(m, tap, 0.0))
                if (dh, dw) in ((0, 1), (1, 0), (1, 1)):
                    kmax = jnp.maximum(kmax, tap[C4:])
        qp = jnp.where(anchor, box * (1.0 / 9.0), 0.0)[0:C4]   # (C4, N)
        kp = kmax                                               # (C4, N)

        # --- attention: qk^T contracted over lanes, row softmax, att = w @ v ---
        qk_t = jax.lax.dot_general(kp, qp, (((1,), (1,)), ((), ())),
                                   preferred_element_type=jnp.float32)  # (C4,C4)
        mx = jnp.max(qk_t, axis=-1, keepdims=True)
        e = jnp.exp(qk_t - mx)
        s = jnp.sum(e, axis=-1, keepdims=True)
        r = pl.reciprocal(s, approx=True)       # EUP slot
        r = r * (2.0 - s * r)                   # one Newton step (tiny (C4,1))
        att_w = e * r
        att = jnp.dot(att_w, v, preferred_element_type=jnp.float32)    # (C4, N)

        # single full-tile, lane-dense, unmasked (C, N) store
        out_ref[...] = jnp.concatenate([x1g, lf, att], axis=0).astype(out_ref.dtype)

    zero2 = lambda b: (0, 0)
    out_flat = pl.pallas_call(
        kernel,
        grid=(B,),
        in_specs=[
            pl.BlockSpec((C2, N), lambda b: (b, 0)),        # x1 slice of batch b
            pl.BlockSpec((C2, N), lambda b: (b, 0)),        # x2 slice of batch b
            pl.BlockSpec((9, C2, 1), lambda b: (0, 0, 0)),  # dw weights (shared)
            pl.BlockSpec((C2, 1), zero2),                   # dw bias
            pl.BlockSpec((Cout, C2), zero2),                # 1x1 weights
            pl.BlockSpec((Cout, 1), zero2),                 # 1x1 bias
        ],
        out_specs=pl.BlockSpec((C, N), lambda b: (b, 0)),
        out_shape=jax.ShapeDtypeStruct((B * C, N), jnp.float32),
        compiler_params=pltpu.CompilerParams(
            dimension_semantics=("parallel",)),
    )(x1f, x2f, dww, dwb, qw, qb)

    # free row-major unflatten: (B*C, H*W) -> (B, C, H, W)
    return out_flat.reshape(B, C, H, W)


def elgca_reference(x, params, heads=4):
    """Pure-JAX reference mirroring the PyTorch forward, for validation."""
    B, C, H, W = x.shape
    C2, C4 = C // 2, C // 4
    x1, x2 = x[:, :C2], x[:, C2:]
    y1 = jax.lax.conv_general_dilated(
        x1, params["dw_w"].reshape(C2, 1, 3, 3), (1, 1), [(1, 1), (1, 1)],
        dimension_numbers=("NCHW", "OIHW", "NCHW"), feature_group_count=C2)
    x1g = _gelu(y1 + params["dw_b"].reshape(1, C2, 1, 1))
    y2 = jax.lax.conv_general_dilated(
        x2, params["q_w"].reshape(-1, C2, 1, 1), (1, 1), [(0, 0), (0, 0)],
        dimension_numbers=("NCHW", "OIHW", "NCHW"))
    y2 = _gelu(y2 + params["q_b"].reshape(1, -1, 1, 1)).reshape(B, heads, C4, H, W)
    q = jnp.sum(y2[:, :-3], axis=1)
    k = y2[:, -3]
    v = y2[:, -2].reshape(B, C4, H * W)
    lfeat = y2[:, -1]
    qp = jax.lax.reduce_window(q, 0.0, jax.lax.add, (1, 1, 3, 3), (1, 1, 2, 2),
                               [(0, 0), (0, 0), (1, 1), (1, 1)]) / 9.0
    kp = jax.lax.reduce_window(k, -jnp.inf, jax.lax.max, (1, 1, 2, 2), (1, 1, 2, 2),
                               [(0, 0), (0, 0), (0, 0), (0, 0)])
    qf, kf = qp.reshape(B, C4, -1), kp.reshape(B, C4, -1)
    qk = jnp.einsum("bcn,bdn->bcd", qf, kf)
    att_w = jnp.swapaxes(jax.nn.softmax(qk, axis=1), 1, 2)
    att = jnp.einsum("bcd,bdn->bcn", att_w, v).reshape(B, C4, H, W)
    return jnp.concatenate([x1g, lfeat, att], axis=1)


if __name__ == "__main__":
    B, C, H, W, heads = 2, 16, 16, 16, 4
    key = jax.random.PRNGKey(0)
    kx, k1, k2, k3, k4 = jax.random.split(key, 5)
    x = jax.random.normal(kx, (B, C, H, W), jnp.float32)
    params = {
        "dw_w": 0.2 * jax.random.normal(k1, (C // 2, 3, 3), jnp.float32),
        "dw_b": 0.1 * jax.random.normal(k2, (C // 2,), jnp.float32),
        "q_w": 0.2 * jax.random.normal(k3, (C // 4 * heads, C // 2), jnp.float32),
        "q_b": 0.1 * jax.random.normal(k4, (C // 4 * heads,), jnp.float32),
    }

    out = jax.block_until_ready(elgca_forward(x, params, heads=heads))
    assert out.shape == (B, C, H, W)

    ref = jax.block_until_ready(elgca_reference(x, params, heads=heads))
    np.testing.assert_allclose(np.asarray(out), np.asarray(ref), rtol=2e-3, atol=2e-3)

    print("KERNEL_OK")
</pallas_src>

<mosaic_0001>
module attributes {stable_mosaic.version = 11 : i64} {
  func.func @kernel(%arg0: i32, %arg1: memref<8x256xf32, #tpu.memory_space<vmem>>, %arg2: memref<8x256xf32, #tpu.memory_space<vmem>>, %arg3: memref<9x8x1xf32, #tpu.memory_space<vmem>>, %arg4: memref<8x1xf32, #tpu.memory_space<vmem>>, %arg5: memref<16x8xf32, #tpu.memory_space<vmem>>, %arg6: memref<16x1xf32, #tpu.memory_space<vmem>>, %arg7: memref<16x256xf32, #tpu.memory_space<vmem>>) attributes {dimension_semantics = [#tpu.dimension_semantics<parallel>], iteration_bounds = array<i64: 2>, scalar_prefetch = 0 : i64, scratch_operands = 0 : i64, tpu.core_type = #tpu.core_type<tc>, window_params = [{transform_indices = @transform_0, window_bounds = array<i64: 8, 256>}, {transform_indices = @transform_1, window_bounds = array<i64: 8, 256>}, {pipeline_mode = #tpu.pipeline_mode<synchronous>, transform_indices = @transform_2, window_bounds = array<i64: 9, 8, 1>}, {pipeline_mode = #tpu.pipeline_mode<synchronous>, transform_indices = @transform_3, window_bounds = array<i64: 8, 1>}, {pipeline_mode = #tpu.pipeline_mode<synchronous>, transform_indices = @transform_4, window_bounds = array<i64: 16, 8>}, {pipeline_mode = #tpu.pipeline_mode<synchronous>, transform_indices = @transform_5, window_bounds = array<i64: 16, 1>}, {transform_indices = @transform_6, window_bounds = array<i64: 16, 256>}]} {
    %c0 = arith.constant 0 : index
    %c0_0 = arith.constant 0 : index
    %0 = vector.load %arg1[%c0, %c0_0] : memref<8x256xf32, #tpu.memory_space<vmem>>, vector<8x256xf32>
    %c0_1 = arith.constant 0 : index
    %c0_2 = arith.constant 0 : index
    %1 = vector.load %arg2[%c0_1, %c0_2] : memref<8x256xf32, #tpu.memory_space<vmem>>, vector<8x256xf32>
    %2 = tpu.iota {dimensions = array<i32: 1>} : vector<8x256xi32>
    %c15_i32 = arith.constant 15 : i32
    %3 = vector.broadcast %c15_i32 : i32 to vector<8x256xi32>
    %4 = arith.andi %2, %3 : vector<8x256xi32>
    %c4_i32 = arith.constant 4 : i32
    %5 = vector.broadcast %c4_i32 : i32 to vector<8x256xi32>
    %6 = arith.shrsi %2, %5 : vector<8x256xi32>
    %c1_i32 = arith.constant 1 : i32
    %7 = vector.broadcast %c1_i32 : i32 to vector<8x256xi32>
    %8 = arith.andi %6, %7 : vector<8x256xi32>
    %c0_i32 = arith.constant 0 : i32
    %9 = vector.broadcast %c0_i32 : i32 to vector<8x256xi32>
    %10 = arith.cmpi eq, %8, %9 : vector<8x256xi32>
    %c1_i32_3 = arith.constant 1 : i32
    %11 = vector.broadcast %c1_i32_3 : i32 to vector<8x256xi32>
    %12 = arith.andi %4, %11 : vector<8x256xi32>
    %c0_i32_4 = arith.constant 0 : i32
    %13 = vector.broadcast %c0_i32_4 : i32 to vector<8x256xi32>
    %14 = arith.cmpi eq, %12, %13 : vector<8x256xi32>
    %15 = arith.andi %10, %14 : vector<8x256xi1>
    %c0_i32_5 = arith.constant 0 : i32
    %16 = vector.broadcast %c0_i32_5 : i32 to vector<8x256xi32>
    %17 = arith.cmpi ne, %4, %16 : vector<8x256xi32>
    %c15_i32_6 = arith.constant 15 : i32
    %18 = vector.broadcast %c15_i32_6 : i32 to vector<8x256xi32>
    %19 = arith.cmpi ne, %4, %18 : vector<8x256xi32>
    %c0_i32_7 = arith.constant 0 : i32
    %20 = vector.broadcast %c0_i32_7 : i32 to vector<8x256xi32>
    %21 = arith.cmpi ne, %6, %20 : vector<8x256xi32>
    %c15_i32_8 = arith.constant 15 : i32
    %22 = vector.broadcast %c15_i32_8 : i32 to vector<8x256xi32>
    %23 = arith.cmpi ne, %6, %22 : vector<8x256xi32>
    %c0_9 = arith.constant 0 : index
    %c0_10 = arith.constant 0 : index
    %24 = vector.load %arg4[%c0_9, %c0_10] : memref<8x1xf32, #tpu.memory_space<vmem>>, vector<8x1xf32>
    %25 = vector.shape_cast %24 : vector<8x1xf32> to vector<8x1xf32>
    %26 = vector.broadcast %25 : vector<8x1xf32> to vector<8x256xf32>
    %c17_i32 = arith.constant 17 : i32
    %27 = tpu.dynamic_rotate %0 by %c17_i32 dim 1 : vector<8x256xf32>, i32 -> vector<8x256xf32>
    %28 = arith.andi %17, %21 : vector<8x256xi1>
    %cst = arith.constant 0.000000e+00 : f32
    %29 = vector.broadcast %cst : f32 to vector<8x256xf32>
    %30 = arith.select %28, %27, %29 : vector<8x256xi1>, vector<8x256xf32>
    %c0_11 = arith.constant 0 : index
    %c0_12 = arith.constant 0 : index
    %c0_13 = arith.constant 0 : index
    %31 = vector.load %arg3[%c0_11, %c0_12, %c0_13] : memref<9x8x1xf32, #tpu.memory_space<vmem>>, vector<1x8x1xf32>
    %32 = vector.shape_cast %31 : vector<1x8x1xf32> to vector<8x1xf32>
    %33 = vector.broadcast %32 : vector<8x1xf32> to vector<8x256xf32>
    %34 = arith.mulf %30, %33 : vector<8x256xf32>
    %35 = arith.addf %26, %34 : vector<8x256xf32>
    %c16_i32 = arith.constant 16 : i32
    %36 = tpu.dynamic_rotate %0 by %c16_i32 dim 1 : vector<8x256xf32>, i32 -> vector<8x256xf32>
    %cst_14 = arith.constant 0.000000e+00 : f32
    %37 = vector.broadcast %cst_14 : f32 to vector<8x256xf32>
    %38 = arith.select %21, %36, %37 : vector<8x256xi1>, vector<8x256xf32>
    %c1 = arith.constant 1 : index
    %c0_15 = arith.constant 0 : index
    %c0_16 = arith.constant 0 : index
    %39 = vector.load %arg3[%c1, %c0_15, %c0_16] : memref<9x8x1xf32, #tpu.memory_space<vmem>>, vector<1x8x1xf32>
    %40 = vector.shape_cast %39 : vector<1x8x1xf32> to vector<8x1xf32>
    %41 = vector.broadcast %40 : vector<8x1xf32> to vector<8x256xf32>
    %42 = arith.mulf %38, %41 : vector<8x256xf32>
    %43 = arith.addf %35, %42 : vector<8x256xf32>
    %c15_i32_17 = arith.constant 15 : i32
    %44 = tpu.dynamic_rotate %0 by %c15_i32_17 dim 1 : vector<8x256xf32>, i32 -> vector<8x256xf32>
    %45 = arith.andi %19, %21 : vector<8x256xi1>
    %cst_18 = arith.constant 0.000000e+00 : f32
    %46 = vector.broadcast %cst_18 : f32 to vector<8x256xf32>
    %47 = arith.select %45, %44, %46 : vector<8x256xi1>, vector<8x256xf32>
    %c2 = arith.constant 2 : index
    %c0_19 = arith.constant 0 : index
    %c0_20 = arith.constant 0 : index
    %48 = vector.load %arg3[%c2, %c0_19, %c0_20] : memref<9x8x1xf32, #tpu.memory_space<vmem>>, vector<1x8x1xf32>
    %49 = vector.shape_cast %48 : vector<1x8x1xf32> to vector<8x1xf32>
    %50 = vector.broadcast %49 : vector<8x1xf32> to vector<8x256xf32>
    %51 = arith.mulf %47, %50 : vector<8x256xf32>
    %52 = arith.addf %43, %51 : vector<8x256xf32>
    %c1_i32_21 = arith.constant 1 : i32
    %53 = tpu.dynamic_rotate %0 by %c1_i32_21 dim 1 : vector<8x256xf32>, i32 -> vector<8x256xf32>
    %cst_22 = arith.constant 0.000000e+00 : f32
    %54 = vector.broadcast %cst_22 : f32 to vector<8x256xf32>
    %55 = arith.select %17, %53, %54 : vector<8x256xi1>, vector<8x256xf32>
    %c3 = arith.constant 3 : index
    %c0_23 = arith.constant 0 : index
    %c0_24 = arith.constant 0 : index
    %56 = vector.load %arg3[%c3, %c0_23, %c0_24] : memref<9x8x1xf32, #tpu.memory_space<vmem>>, vector<1x8x1xf32>
    %57 = vector.shape_cast %56 : vector<1x8x1xf32> to vector<8x1xf32>
    %58 = vector.broadcast %57 : vector<8x1xf32> to vector<8x256xf32>
    %59 = arith.mulf %55, %58 : vector<8x256xf32>
    %60 = arith.addf %52, %59 : vector<8x256xf32>
    %c4 = arith.constant 4 : index
    %c0_25 = arith.constant 0 : index
    %c0_26 = arith.constant 0 : index
    %61 = vector.load %arg3[%c4, %c0_25, %c0_26] : memref<9x8x1xf32, #tpu.memory_space<vmem>>, vector<1x8x1xf32>
    %62 = vector.shape_cast %61 : vector<1x8x1xf32> to vector<8x1xf32>
    %63 = vector.broadcast %62 : vector<8x1xf32> to vector<8x256xf32>
    %64 = arith.mulf %0, %63 : vector<8x256xf32>
    %65 = arith.addf %60, %64 : vector<8x256xf32>
    %c255_i32 = arith.constant 255 : i32
    %66 = tpu.dynamic_rotate %0 by %c255_i32 dim 1 : vector<8x256xf32>, i32 -> vector<8x256xf32>
    %cst_27 = arith.constant 0.000000e+00 : f32
    %67 = vector.broadcast %cst_27 : f32 to vector<8x256xf32>
    %68 = arith.select %19, %66, %67 : vector<8x256xi1>, vector<8x256xf32>
    %c5 = arith.constant 5 : index
    %c0_28 = arith.constant 0 : index
    %c0_29 = arith.constant 0 : index
    %69 = vector.load %arg3[%c5, %c0_28, %c0_29] : memref<9x8x1xf32, #tpu.memory_space<vmem>>, vector<1x8x1xf32>
    %70 = vector.shape_cast %69 : vector<1x8x1xf32> to vector<8x1xf32>
    %71 = vector.broadcast %70 : vector<8x1xf32> to vector<8x256xf32>
    %72 = arith.mulf %68, %71 : vector<8x256xf32>
    %73 = arith.addf %65, %72 : vector<8x256xf32>
    %c241_i32 = arith.constant 241 : i32
    %74 = tpu.dynamic_rotate %0 by %c241_i32 dim 1 : vector<8x256xf32>, i32 -> vector<8x256xf32>
    %75 = arith.andi %17, %23 : vector<8x256xi1>
    %cst_30 = arith.constant 0.000000e+00 : f32
    %76 = vector.broadcast %cst_30 : f32 to vector<8x256xf32>
    %77 = arith.select %75, %74, %76 : vector<8x256xi1>, vector<8x256xf32>
    %c6 = arith.constant 6 : index
    %c0_31 = arith.constant 0 : index
    %c0_32 = arith.constant 0 : index
    %78 = vector.load %arg3[%c6, %c0_31, %c0_32] : memref<9x8x1xf32, #tpu.memory_space<vmem>>, vector<1x8x1xf32>
    %79 = vector.shape_cast %78 : vector<1x8x1xf32> to vector<8x1xf32>
    %80 = vector.broadcast %79 : vector<8x1xf32> to vector<8x256xf32>
    %81 = arith.mulf %77, %80 : vector<8x256xf32>
    %82 = arith.addf %73, %81 : vector<8x256xf32>
    %c240_i32 = arith.constant 240 : i32
    %83 = tpu.dynamic_rotate %0 by %c240_i32 dim 1 : vector<8x256xf32>, i32 -> vector<8x256xf32>
    %cst_33 = arith.constant 0.000000e+00 : f32
    %84 = vector.broadcast %cst_33 : f32 to vector<8x256xf32>
    %85 = arith.select %23, %83, %84 : vector<8x256xi1>, vector<8x256xf32>
    %c7 = arith.constant 7 : index
    %c0_34 = arith.constant 0 : index
    %c0_35 = arith.constant 0 : index
    %86 = vector.load %arg3[%c7, %c0_34, %c0_35] : memref<9x8x1xf32, #tpu.memory_space<vmem>>, vector<1x8x1xf32>
    %87 = vector.shape_cast %86 : vector<1x8x1xf32> to vector<8x1xf32>
    %88 = vector.broadcast %87 : vector<8x1xf32> to vector<8x256xf32>
    %89 = arith.mulf %85, %88 : vector<8x256xf32>
    %90 = arith.addf %82, %89 : vector<8x256xf32>
    %c239_i32 = arith.constant 239 : i32
    %91 = tpu.dynamic_rotate %0 by %c239_i32 dim 1 : vector<8x256xf32>, i32 -> vector<8x256xf32>
    %92 = arith.andi %19, %23 : vector<8x256xi1>
    %cst_36 = arith.constant 0.000000e+00 : f32
    %93 = vector.broadcast %cst_36 : f32 to vector<8x256xf32>
    %94 = arith.select %92, %91, %93 : vector<8x256xi1>, vector<8x256xf32>
    %c8 = arith.constant 8 : index
    %c0_37 = arith.constant 0 : index
    %c0_38 = arith.constant 0 : index
    %95 = vector.load %arg3[%c8, %c0_37, %c0_38] : memref<9x8x1xf32, #tpu.memory_space<vmem>>, vector<1x8x1xf32>
    %96 = vector.shape_cast %95 : vector<1x8x1xf32> to vector<8x1xf32>
    %97 = vector.broadcast %96 : vector<8x1xf32> to vector<8x256xf32>
    %98 = arith.mulf %94, %97 : vector<8x256xf32>
    %99 = arith.addf %90, %98 : vector<8x256xf32>
    %cst_39 = arith.constant 5.000000e-01 : f32
    %100 = vector.broadcast %cst_39 : f32 to vector<8x256xf32>
    %101 = arith.mulf %100, %99 : vector<8x256xf32>
    %cst_40 = arith.constant 0.707106769 : f32
    %102 = vector.broadcast %cst_40 : f32 to vector<8x256xf32>
    %103 = arith.mulf %99, %102 : vector<8x256xf32>
    %104 = math.erf %103 : vector<8x256xf32>
    %cst_41 = arith.constant 1.000000e+00 : f32
    %105 = vector.broadcast %cst_41 : f32 to vector<8x256xf32>
    %106 = arith.addf %105, %104 : vector<8x256xf32>
    %107 = arith.mulf %101, %106 : vector<8x256xf32>
    %c0_42 = arith.constant 0 : index
    %c0_43 = arith.constant 0 : index
    %108 = vector.load %arg5[%c0_42, %c0_43] : memref<16x8xf32, #tpu.memory_space<vmem>>, vector<16x8xf32>
    %cst_44 = arith.constant dense<0.000000e+00> : vector<16x256xf32>
    %109 = tpu.matmul %108, %1, %cst_44 {dimension_numbers = #tpu.dot_dimension_numbers<[1], [0], [0], [1], [0, 0, 1, 1], [], []>} : vector<16x8xf32>, vector<8x256xf32>, vector<16x256xf32> -> vector<16x256xf32>
    %c0_45 = arith.constant 0 : index
    %c0_46 = arith.constant 0 : index
    %110 = vector.load %arg6[%c0_45, %c0_46] : memref<16x1xf32, #tpu.memory_space<vmem>>, vector<16x1xf32>
    %111 = vector.broadcast %110 : vector<16x1xf32> to vector<16x256xf32>
    %112 = arith.addf %109, %111 : vector<16x256xf32>
    %cst_47 = arith.constant 5.000000e-01 : f32
    %113 = vector.broadcast %cst_47 : f32 to vector<16x256xf32>
    %114 = arith.mulf %113, %112 : vector<16x256xf32>
    %cst_48 = arith.constant 0.707106769 : f32
    %115 = vector.broadcast %cst_48 : f32 to vector<16x256xf32>
    %116 = arith.mulf %112, %115 : vector<16x256xf32>
    %117 = math.erf %116 : vector<16x256xf32>
    %cst_49 = arith.constant 1.000000e+00 : f32
    %118 = vector.broadcast %cst_49 : f32 to vector<16x256xf32>
    %119 = arith.addf %118, %117 : vector<16x256xf32>
    %120 = arith.mulf %114, %119 : vector<16x256xf32>
    %121 = vector.extract_strided_slice %120 {offsets = [0, 0], sizes = [8, 256], strides = [1, 1]} : vector<16x256xf32> to vector<8x256xf32>
    %122 = vector.extract_strided_slice %120 {offsets = [8, 0], sizes = [4, 256], strides = [1, 1]} : vector<16x256xf32> to vector<4x256xf32>
    %123 = vector.extract_strided_slice %120 {offsets = [12, 0], sizes = [4, 256], strides = [1, 1]} : vector<16x256xf32> to vector<4x256xf32>
    %cst_50 = arith.constant 0.000000e+00 : f32
    %124 = vector.broadcast %cst_50 : f32 to vector<8x256xf32>
    %125 = vector.extract_strided_slice %121 {offsets = [4, 0], sizes = [4, 256], strides = [1, 1]} : vector<8x256xf32> to vector<4x256xf32>
    %c17_i32_51 = arith.constant 17 : i32
    %126 = tpu.dynamic_rotate %121 by %c17_i32_51 dim 1 : vector<8x256xf32>, i32 -> vector<8x256xf32>
    %127 = arith.andi %17, %21 : vector<8x256xi1>
    %cst_52 = arith.constant 0.000000e+00 : f32
    %128 = vector.broadcast %cst_52 : f32 to vector<8x256xf32>
    %129 = arith.select %127, %126, %128 : vector<8x256xi1>, vector<8x256xf32>
    %130 = arith.addf %124, %129 : vector<8x256xf32>
    %c16_i32_53 = arith.constant 16 : i32
    %131 = tpu.dynamic_rotate %121 by %c16_i32_53 dim 1 : vector<8x256xf32>, i32 -> vector<8x256xf32>
    %cst_54 = arith.constant 0.000000e+00 : f32
    %132 = vector.broadcast %cst_54 : f32 to vector<8x256xf32>
    %133 = arith.select %21, %131, %132 : vector<8x256xi1>, vector<8x256xf32>
    %134 = arith.addf %130, %133 : vector<8x256xf32>
    %c15_i32_55 = arith.constant 15 : i32
    %135 = tpu.dynamic_rotate %121 by %c15_i32_55 dim 1 : vector<8x256xf32>, i32 -> vector<8x256xf32>
    %136 = arith.andi %19, %21 : vector<8x256xi1>
    %cst_56 = arith.constant 0.000000e+00 : f32
    %137 = vector.broadcast %cst_56 : f32 to vector<8x256xf32>
    %138 = arith.select %136, %135, %137 : vector<8x256xi1>, vector<8x256xf32>
    %139 = arith.addf %134, %138 : vector<8x256xf32>
    %c1_i32_57 = arith.constant 1 : i32
    %140 = tpu.dynamic_rotate %121 by %c1_i32_57 dim 1 : vector<8x256xf32>, i32 -> vector<8x256xf32>
    %cst_58 = arith.constant 0.000000e+00 : f32
    %141 = vector.broadcast %cst_58 : f32 to vector<8x256xf32>
    %142 = arith.select %17, %140, %141 : vector<8x256xi1>, vector<8x256xf32>
    %143 = arith.addf %139, %142 : vector<8x256xf32>
    %144 = arith.addf %143, %121 : vector<8x256xf32>
    %c255_i32_59 = arith.constant 255 : i32
    %145 = tpu.dynamic_rotate %121 by %c255_i32_59 dim 1 : vector<8x256xf32>, i32 -> vector<8x256xf32>
    %cst_60 = arith.constant 0.000000e+00 : f32
    %146 = vector.broadcast %cst_60 : f32 to vector<8x256xf32>
    %147 = arith.select %19, %145, %146 : vector<8x256xi1>, vector<8x256xf32>
    %148 = arith.addf %144, %147 : vector<8x256xf32>
    %149 = vector.extract_strided_slice %145 {offsets = [4, 0], sizes = [4, 256], strides = [1, 1]} : vector<8x256xf32> to vector<4x256xf32>
    %150 = arith.maximumf %125, %149 : vector<4x256xf32>
    %c241_i32_61 = arith.constant 241 : i32
    %151 = tpu.dynamic_rotate %121 by %c241_i32_61 dim 1 : vector<8x256xf32>, i32 -> vector<8x256xf32>
    %152 = arith.andi %17, %23 : vector<8x256xi1>
    %cst_62 = arith.constant 0.000000e+00 : f32
    %153 = vector.broadcast %cst_62 : f32 to vector<8x256xf32>
    %154 = arith.select %152, %151, %153 : vector<8x256xi1>, vector<8x256xf32>
    %155 = arith.addf %148, %154 : vector<8x256xf32>
    %c240_i32_63 = arith.constant 240 : i32
    %156 = tpu.dynamic_rotate %121 by %c240_i32_63 dim 1 : vector<8x256xf32>, i32 -> vector<8x256xf32>
    %cst_64 = arith.constant 0.000000e+00 : f32
    %157 = vector.broadcast %cst_64 : f32 to vector<8x256xf32>
    %158 = arith.select %23, %156, %157 : vector<8x256xi1>, vector<8x256xf32>
    %159 = arith.addf %155, %158 : vector<8x256xf32>
    %160 = vector.extract_strided_slice %156 {offsets = [4, 0], sizes = [4, 256], strides = [1, 1]} : vector<8x256xf32> to vector<4x256xf32>
    %161 = arith.maximumf %150, %160 : vector<4x256xf32>
    %c239_i32_65 = arith.constant 239 : i32
    %162 = tpu.dynamic_rotate %121 by %c239_i32_65 dim 1 : vector<8x256xf32>, i32 -> vector<8x256xf32>
    %163 = arith.andi %19, %23 : vector<8x256xi1>
    %cst_66 = arith.constant 0.000000e+00 : f32
    %164 = vector.broadcast %cst_66 : f32 to vector<8x256xf32>
    %165 = arith.select %163, %162, %164 : vector<8x256xi1>, vector<8x256xf32>
    %166 = arith.addf %159, %165 : vector<8x256xf32>
    %167 = vector.extract_strided_slice %162 {offsets = [4, 0], sizes = [4, 256], strides = [1, 1]} : vector<8x256xf32> to vector<4x256xf32>
    %168 = arith.maximumf %161, %167 : vector<4x256xf32>
    %cst_67 = arith.constant 0.111111112 : f32
    %169 = vector.broadcast %cst_67 : f32 to vector<8x256xf32>
    %170 = arith.mulf %166, %169 : vector<8x256xf32>
    %cst_68 = arith.constant 0.000000e+00 : f32
    %171 = vector.broadcast %cst_68 : f32 to vector<8x256xf32>
    %172 = arith.select %15, %170, %171 : vector<8x256xi1>, vector<8x256xf32>
    %173 = vector.extract_strided_slice %172 {offsets = [0, 0], sizes = [4, 256], strides = [1, 1]} : vector<8x256xf32> to vector<4x256xf32>
    %cst_69 = arith.constant dense<0.000000e+00> : vector<4x4xf32>
    %174 = tpu.matmul %168, %173, %cst_69 {dimension_numbers = #tpu.dot_dimension_numbers<[1], [1], [0], [0], [0, 0, 1, 0], [], []>} : vector<4x256xf32>, vector<4x256xf32>, vector<4x4xf32> -> vector<4x4xf32>
    %cst_70 = arith.constant dense<0xFF800000> : vector<4xf32>
    %175 = vector.multi_reduction <maximumf>, %174, %cst_70 [1] : vector<4x4xf32> to vector<4xf32>
    %176 = vector.shape_cast %175 : vector<4xf32> to vector<4x1xf32>
    %177 = vector.broadcast %176 : vector<4x1xf32> to vector<4x4xf32>
    %178 = arith.subf %174, %177 : vector<4x4xf32>
    %179 = math.exp %178 : vector<4x4xf32>
    %cst_71 = arith.constant dense<0.000000e+00> : vector<4xf32>
    %180 = vector.multi_reduction <add>, %179, %cst_71 [1] : vector<4x4xf32> to vector<4xf32>
    %181 = vector.shape_cast %180 : vector<4xf32> to vector<4x1xf32>
    %182 = tpu.reciprocal %181 {approx = true} : vector<4x1xf32> -> vector<4x1xf32>
    %183 = arith.mulf %181, %182 : vector<4x1xf32>
    %cst_72 = arith.constant 2.000000e+00 : f32
    %184 = vector.broadcast %cst_72 : f32 to vector<4x1xf32>
    %185 = arith.subf %184, %183 : vector<4x1xf32>
    %186 = arith.mulf %182, %185 : vector<4x1xf32>
    %187 = vector.broadcast %186 : vector<4x1xf32> to vector<4x4xf32>
    %188 = arith.mulf %179, %187 : vector<4x4xf32>
    %cst_73 = arith.constant dense<0.000000e+00> : vector<4x256xf32>
    %189 = tpu.matmul %188, %122, %cst_73 {dimension_numbers = #tpu.dot_dimension_numbers<[1], [0], [0], [1], [0, 0, 1, 1], [], []>} : vector<4x4xf32>, vector<4x256xf32>, vector<4x256xf32> -> vector<4x256xf32>
    %190 = tpu.concatenate %107, %123, %189 in 0 : vector<8x256xf32>, vector<4x256xf32>, vector<4x256xf32> -> vector<16x256xf32>
    %c0_74 = arith.constant 0 : index
    %c0_75 = arith.constant 0 : index
    %191 = vector.load %arg7[%c0_74, %c0_75] : memref<16x256xf32, #tpu.memory_space<vmem>>, vector<16x256xf32>
    tpu.vector_store %arg7[%c0_74, %c0_75], %190 {strides = array<i32>} : memref<16x256xf32, #tpu.memory_space<vmem>>, vector<16x256xf32>,
    return
  }
  func.func @transform_0(%arg0: i32) -> (i32, i32) {
    %c0_i32 = arith.constant 0 : i32
    %c0_i32_0 = arith.constant 0 : i32
    return %arg0, %c0_i32 : i32, i32
  }
  func.func @transform_1(%arg0: i32) -> (i32, i32) {
    %c0_i32 = arith.constant 0 : i32
    %c0_i32_0 = arith.constant 0 : i32
    return %arg0, %c0_i32 : i32, i32
  }
  func.func @transform_2(%arg0: i32) -> (i32, i32, i32) {
    %c0_i32 = arith.constant 0 : i32
    %c0_i32_0 = arith.constant 0 : i32
    %c0_i32_1 = arith.constant 0 : i32
    %c0_i32_2 = arith.constant 0 : i32
    return %c0_i32, %c0_i32_0, %c0_i32_1 : i32, i32, i32
  }
  func.func @transform_3(%arg0: i32) -> (i32, i32) {
    %c0_i32 = arith.constant 0 : i32
    %c0_i32_0 = arith.constant 0 : i32
    %c0_i32_1 = arith.constant 0 : i32
    return %c0_i32, %c0_i32_0 : i32, i32
  }
  func.func @transform_4(%arg0: i32) -> (i32, i32) {
    %c0_i32 = arith.constant 0 : i32
    %c0_i32_0 = arith.constant 0 : i32
    %c0_i32_1 = arith.constant 0 : i32
    return %c0_i32, %c0_i32_0 : i32, i32
  }
  func.func @transform_5(%arg0: i32) -> (i32, i32) {
    %c0_i32 = arith.constant 0 : i32
    %c0_i32_0 = arith.constant 0 : i32
    %c0_i32_1 = arith.constant 0 : i32
    return %c0_i32, %c0_i32_0 : i32, i32
  }
  func.func @transform_6(%arg0: i32) -> (i32, i32) {
    %c0_i32 = arith.constant 0 : i32
    %c0_i32_0 = arith.constant 0 : i32
    return %arg0, %c0_i32 : i32, i32
  }
}

</mosaic_0001>

<bundles_post_ra>
// kernel: tpu_custom_call.1
= control target key start
LH: loop header
LB: loop body
LE: loop exit
PB: predicated region body
PF: predicated region fallthrough
CT: control target
= control target key end

     0   :  { %11 = vsyncpa [#allocation3], 0  ;;  %s1708_s0 = inlined_call_operand.vmem [shape: f32[16,256], index: 0, kind: input, shape index: {}]   ;;  %s1709_s1 = inlined_call_operand.vmem [shape: f32[16,256], index: 1, kind: input, shape index: {}]   ;;  %s1710_s2 = inlined_call_operand.vmem [shape: f32[9,8,1], index: 2, kind: input, shape index: {}]   ;;  %s1711_s3 = inlined_call_operand.vmem [shape: f32[8,1], index: 3, kind: input, shape index: {}]   ;;  %s1712_s4 = inlined_call_operand.vmem [shape: f32[16,8], index: 4, kind: input, shape index: {}]   ;;  %s1713_s5 = inlined_call_operand.vmem [shape: f32[16,1], index: 5, kind: input, shape index: {}]   ;;  %s1714_s6 = inlined_call_operand.hbm [shape: f32[32,256], index: 6, kind: output, shape index: {}]  }
   0x1   :  { %13 = vsyncpa [#allocation3 + $0x1], 0  ;;  %s1193_s21 = smov 0   ;;  %s1195_s22 = smov 0  }
   0x2   :  { %s1197_s23 = smov 0   ;;  %s1199_s24 = smov 0  }
   0x3 LB: > { %s1214_s25 = sadd.s32 4294967295, %s1144_s24   ;;  %s982_s26 = sadd.s32 4294967294, %s1144_s24   ;;  %s1144_s24 = sphi %s1199_s24, %s1791_s24   ;;  %s1140_s23 = sphi %s1197_s23, %s1790_s23   ;;  %s1136_s22 = sphi %s1195_s22, %s1789_s22   ;;  %s1132_s21 = sphi %s1193_s21, %s1788_s21  }
   0x4   : > { %s1218_s27 = sadd.s32 1, %s1144_s24   ;;  %s162_s28 = sadd.s32 1, %s1140_s23 }
   0x5   : > { %s159_s29 = ssub.s32 %s1144_s24, %s1218_s27  ;;  %p172_p0 = scmp.ne.s32.totalorder %s1140_s23, %s1136_s22 }
   0x6   : > { %p160_p1 = scmp.eq.s32.totalorder %s159_s29, 0  ;;  %p173_p2 = scmp.eq.s32.totalorder %s1214_s25, 1 }
   0x7   : > { %p178_p3 = scmp.ne.s32.totalorder %s1136_s22, %s1132_s21  ;;  %p179_p4 = scmp.eq.s32.totalorder %s982_s26, 1 }
   0x8   : > { %s1229_s30 = scalar_select %p160_p1, %s1140_s23, %s162_s28  }
   0x9   : > { %p1231_p5 = por %p173_p2, %p172_p0  ;;  %p1235_p6 = por %p179_p4, %p178_p3 }
   0xa   : > { %p985_p7 = scmp.ge.s32.totalorder %s1144_s24, 1  ;;  %p225_p8 = scmp.lt.s32.totalorder %s1144_s24, 3 }
   0xc   : > { %p226_p9 = pnand %p985_p7, %p225_p8 }
   0xd   : > { %p260_p10 = scmp.lt.s32.totalorder (!%p226_p9), %s1214_s25, 1  ;;  %s1148_s18 = smov (!%p226_p9), 16  }
   0xe   : > { %229 = sbr.rel (%p226_p9) target bundleno = 1128 (0x468), region = 44  ;;  %s1149_s19 = smov (!%p226_p9), 17  }
   0xf   : > { %s1150_s20 = smov (!%p226_p9), 15   ;;  %s1151_s26 = smov (!%p226_p9), 1  }
  0x10   : > { %s1736_s28 = smov (!%p226_p9), 127   ;;  %s1734_s29 = smov (!%p226_p9), 113  }
  0x11   : > { %s1732_s9 = smov (!%p226_p9), 112   ;;  %s1730_s10 = smov (!%p226_p9), 111  }
  0x12   : > { %s1764_s17 = smov (!%p226_p9), 112   ;;  %s1765_s13 = smov (!%p226_p9), 111  }
  0x13   : > { %v496_v0 = vld [vmem:[%s1713_s5] sm:$0xff]  ;;  %v1146_v1 = vmov 0.0   ;;  %v1147_v2 = vmov 0   ;;  %s1247_s11 = scalar_select %p260_p10, %s1214_s25, 1  ;;  %vm508_vm0 = vcmask 64512   ;;  %v275_v21 = vlaneseq }
  0x14   : > { %579 = vmatprep.mubr.f32.mxu0 %v1146_v1  ;;  %1066 = vset.pattern.permute.xlu0 %v1147_v2  ;;  %v494_v4 = vld [vmem:[%s1712_s4] sm:$0xff] }
  0x15   : > { %500 = vperm.xlu0 %1066, %v496_v0   ;;  %1067 = vset.pattern.permute.xlu1 %v1147_v2  ;;  %s1012_s12 = sshll.u32 %s1247_s11, 4  ;;  %v1296_v22 = vand.u32 127, %v275_v21 }
  0x16   : > { %s269_s15 = scalar_lea.vmem %s1709_s1, %s1012_s12 }
  0x17   : > { %v274_v3 = vld [vmem:[%s269_s15 + $0x8] sm:$0xff]  ;;  %v273_v5 = vld [vmem:[%s269_s15] sm:$0xff]  ;;  %v277_v25 = vadd.s32 128, %v1296_v22  ;;  %v1300_v28 = vshra.s32 %v1296_v22, 4  ;;  %v1303_v29 = vand.u32 15, %v1296_v22  ;;  %vm1719_vm2 = vcmp.lt.s32.totalorder %v1296_v22, 16 }
  0x18   : > { %545 = vmatprep.subr.mxu0 %v274_v3  ;;  %vm1718_vm8 = vcmp.lt.s32.totalorder %v1296_v22, 15  ;;  %vm310_vm9 = vcmp.lt.s32.totalorder %v1296_v22, 17  ;;  %vm1716_vm13 = vcmp.lt.s32.totalorder %v1296_v22, 1  ;;  %vm1720_vm15 = vcmp.lt.s32.totalorder %v1296_v22, 127  ;;  %s1156_s15 = smov [#allocation2]  }
  0x19   : > { %546 = vmatpush1.msra.mxu0 %v273_v5  ;;  %v1305_v30 = vshra.s32 %v277_v25, 4  ;;  %v1307_v31 = vand.u32 15, %v277_v25  ;;  %vm1724_vm1 = vcmp.ne.s32.totalorder %v1303_v29, 0  ;;  %vm1717_vm4 = vcmp.ne.s32.totalorder %v1300_v28, 0  ;;  %s1088_s16 = sshll.u32 %s1156_s15, 4  ;;  %s1089_s16 = int_to_ptr.vmem [resolvable:$false] %s1088_s16 }
  0x1a   : > { %999 = vmatmul.mubr.msk.f32.vlgmr.msra.gmra.mxu0 %vm508_vm0, %v494_v4  ;;  %vm1726_vm5 = vcmp.ne.s32.totalorder %v1303_v29, 15  ;;  %vm1322_vm10 = vmand %vm1724_vm1, %vm1717_vm4  ;;  %s1090_s14 = scalar_lea.vmem %s1089_s16, 1024 }
  0x1b   : > { %585 = vmatprep.mubr.f32.mxu0 %v1146_v1  ;;  %vm1721_vm3 = vcmp.ne.s32.totalorder %v1307_v31, 0  ;;  %vm1715_vm6 = vcmp.ne.s32.totalorder %v1305_v30, 0  ;;  %vm1728_vm7 = vcmp.ne.s32.totalorder %v1307_v31, 15  ;;  %vm1342_vm12 = vmand %vm1726_vm5, %vm1717_vm4 }
  0x1c   : > { %vm1334_vm11 = vmand %vm1721_vm3, %vm1715_vm6 }
  0x1d   : > { %vm1351_vm14 = vmand %vm1728_vm7, %vm1715_vm6 }
  0x90   : > { %v501_v6 = vpop.permute.xlu0 %500 }
  0xda   : > { %v581_v7 = vpop.f32.mrf.mxu0 }
  0xdb   : > { %v582_v8 = vadd.f32 %v581_v7, %v501_v6 }
  0xdc   : > { %v583_v9 = vpop.f32.mrf.mxu0 }
  0xdd   : > { %v596_v10 = vmul.f32 0.70710677, %v582_v8  ;;  %v584_v11 = vadd.f32 %v583_v9, %v501_v6  ;;  %v592_v14 = vmul.f32 0.5, %v582_v8 }
  0xdf   : > { %1068 = verf.f32 %v596_v10  ;;  %v597_v12 = vmul.f32 0.70710677, %v584_v11  ;;  %v593_v19 = vmul.f32 0.5, %v584_v11 }
  0xe1   : > { %1070 = verf.f32 %v597_v12 }
  0xec   : > { %v1069_v13 = vpop.eup %1068 }
  0xed   : > { %v604_v15 = vadd.f32 1.0, %v1069_v13 }
  0xee   : > { %v1071_v16 = vpop.eup %1070 }
  0xef   : > { %v1260_v17 = vmul.f32 %v604_v15, %v592_v14  ;;  %v605_v18 = vadd.f32 1.0, %v1071_v16  ;;  %v283_v15 = vand.u32 1, %v1305_v30 }
  0xf1   : > { %622 = vrot.lane.b32.xlu1 %v1260_v17, %s1148_s18  ;;  %612 = vrot.lane.b32.xlu0 %v1260_v17, %s1149_s19  ;;  %v1266_v20 = vmul.f32 %v605_v18, %v593_v19 }
  0xf5   : > { %632 = vrot.lane.b32.xlu1 %v1260_v17, %s1150_s20  ;;  %624 = vrot.lane.b32.xlu0 %v1266_v20, %s1148_s18 }
  0xf9   : > { %642 = vrot.lane.b32.xlu1 %v1260_v17, %s1151_s26  ;;  %634 = vrot.lane.b32.xlu0 %v1266_v20, %s1150_s20 }
  0xfd   : > { %614 = vrot.lane.b32.xlu1 %v1266_v20, %s1149_s19  ;;  %644 = vrot.lane.b32.xlu0 %v1266_v20, %s1151_s26 }
 0x101   : > { %654 = vrot.lane.b32.xlu1 %v1260_v17, %s1736_s28  ;;  %656 = vrot.lane.b32.xlu0 %v1266_v20, %s1736_s28 }
 0x105   : > { %666 = vrot.lane.b32.xlu1 %v1260_v17, %s1734_s29  ;;  %668 = vrot.lane.b32.xlu0 %v1266_v20, %s1734_s29  ;;  %s1762_s29 = smov 127  }
 0x109   : > { %676 = vrot.lane.b32.xlu1 %v1260_v17, %s1732_s9  ;;  %678 = vrot.lane.b32.xlu0 %v1266_v20, %s1732_s9  ;;  %s264_s9 = scalar_lea.vmem %s1708_s0, %s1012_s12 }
 0x10d   : > { %688 = vrot.lane.b32.xlu1 %v1260_v17, %s1730_s10  ;;  %690 = vrot.lane.b32.xlu0 %v1266_v20, %s1730_s10 }
 0x163   : > { %v623_v23 = vpop.permute.xlu1 %622  ;;  %v613_v24 = vpop.permute.xlu0 %612 }
 0x167   : > { %v633_v26 = vpop.permute.xlu1 %632  ;;  %v625_v27 = vpop.permute.xlu0 %624 }
 0x168   : > { %v626_v35 = vsel %vm1719_vm2, %v623_v23, %v625_v27  ;;  %v627_v36 = vsel %vm1719_vm2, %v625_v27, %v623_v23  ;;  %v287_v23 = vand.u32 1, %v1307_v31 }
 0x169   : > { %v628_v46 = vsel %vm1717_vm4, %v627_v36, 0.0  ;;  %v629_v47 = vsel %vm1715_vm6, %v626_v35, 0.0  ;;  %vm1725_vm6 = vcmp.ne.s32.totalorder %v1300_v28, 15  ;;  %vm1722_vm4 = vcmp.lt.s32.totalorder %v1296_v22, 113 }
 0x16b   : > { %v643_v32 = vpop.permute.xlu1 %642  ;;  %v635_v33 = vpop.permute.xlu0 %634 }
 0x16c   : > { %v636_v42 = vsel %vm1718_vm8, %v633_v26, %v635_v33  ;;  %v637_v43 = vsel %vm1718_vm8, %v635_v33, %v633_v26  ;;  %vm1395_vm8 = vmand %vm1724_vm1, %vm1725_vm6 }
 0x16d   : > { %v638_v54 = vsel %vm1342_vm12, %v637_v43, 0.0  ;;  %v639_v55 = vsel %vm1351_vm14, %v636_v42, 0.0 }
 0x16f   : > { %v615_v39 = vpop.permute.xlu1 %614  ;;  %v645_v40 = vpop.permute.xlu0 %644 }
 0x170   : > { %v616_v44 = vsel %vm310_vm9, %v613_v24, %v615_v39  ;;  %v617_v45 = vsel %vm310_vm9, %v615_v39, %v613_v24  ;;  %v646_v52 = vsel %vm1716_vm13, %v643_v32, %v645_v40  ;;  %v647_v53 = vsel %vm1716_vm13, %v645_v40, %v643_v32 }
 0x171   : > { %v618_v48 = vsel %vm1322_vm10, %v617_v45, 0.0  ;;  %v619_v49 = vsel %vm1334_vm11, %v616_v44, 0.0  ;;  %v648_v60 = vsel %vm1724_vm1, %v647_v53, 0.0  ;;  %v649_v61 = vsel %vm1721_vm3, %v646_v52, 0.0 }
 0x172   : > { %v630_v50 = vadd.f32 %v628_v46, %v618_v48  ;;  %v631_v51 = vadd.f32 %v629_v47, %v619_v49  ;;  %vm1727_vm13 = vcmp.ne.s32.totalorder %v1305_v30, 15  ;;  %v282_v24 = vand.u32 1, %v1300_v28 }
 0x173   : > { %v655_v56 = vpop.permute.xlu1 %654  ;;  %v657_v57 = vpop.permute.xlu0 %656  ;;  %vm1405_vm2 = vmand %vm1721_vm3, %vm1727_vm13  ;;  %vm1729_vm3 = vcmp.lt.s32.totalorder %v1296_v22, 111  ;;  %v286_v40 = vand.u32 1, %v1303_v29  ;;  %vm1452_vm1 = vcmp.eq.s32.totalorder %v283_v15, 0 }
 0x174   : > { %v640_v58 = vadd.f32 %v638_v54, %v630_v50  ;;  %v641_v59 = vadd.f32 %v639_v55, %v631_v51  ;;  %v658_v0 = vsel %vm1720_vm15, %v655_v56, %v657_v57  ;;  %v659_v2 = vsel %vm1720_vm15, %v657_v57, %v655_v56 }
 0x175   : > { %v660_v11 = vsel %vm1726_vm5, %v658_v0, 0.0  ;;  %v661_v12 = vsel %vm1728_vm7, %v659_v2, 0.0  ;;  %vm1723_vm15 = vcmp.lt.s32.totalorder %v1296_v22, 112  ;;  %v665_v33 = vmax.f32 %v1266_v20, %v659_v2 }
 0x176   : > { %v650_v62 = vadd.f32 %v648_v60, %v640_v58  ;;  %v651_v63 = vadd.f32 %v649_v61, %v641_v59  ;;  %v664_v43 = vmax.f32 %v1260_v17, %v658_v0 }
 0x177   : > { %v667_v3 = vpop.permute.xlu1 %666  ;;  %v669_v5 = vpop.permute.xlu0 %668 }
 0x178   : > { %v652_v6 = vadd.f32 %v650_v62, %v1260_v17  ;;  %v653_v7 = vadd.f32 %v651_v63, %v1266_v20  ;;  %v670_v9 = vsel %vm1722_vm4, %v667_v3, %v669_v5  ;;  %v671_v10 = vsel %vm1722_vm4, %v669_v5, %v667_v3  ;;  %vm1439_vm4 = vmand %vm1726_vm5, %vm1725_vm6  ;;  %v495_v63 = vld [vmem:[%s1712_s4 + $0x8] sm:$0xff]  ;;  %v317_v5 = vld [vmem:[%s1710_s2] sm:$0xff] }
 0x179   : > { %v672_v16 = vsel %vm1395_vm8, %v670_v9, 0.0  ;;  %v673_v18 = vsel %vm1405_vm2, %v671_v10, 0.0  ;;  %vm1461_vm5 = vcmp.eq.s32.totalorder %v282_v24, 0  ;;  %1000 = vmatmul.mubr.msk.f32.gmra.mxu0 %vm508_vm0, %v495_v63  ;;  %v1503_v9 = vld [vmem:[%s264_s9 + $0x8] sm:$0xff]  ;;  %v994_v10 = vld [vmem:[%s1710_s2 + $0x20] sm:$0xff]  ;;  %vm799_vm0 = vcmask 1043456  }
 0x17a   : > { %v662_v13 = vadd.f32 %v660_v11, %v652_v6  ;;  %v663_v14 = vadd.f32 %v661_v12, %v653_v7  ;;  %v1496_v6 = vld [vmem:[%s264_s9] sm:$0xff]  ;;  %v992_v7 = vld [vmem:[%s1710_s2 + $0x10] sm:$0xff]  ;;  %s1763_s9 = smov 113   ;;  %v995_v24 = vld [vmem:[%s1710_s2 + $0x28] sm:$0xff] }
 0x17b   : > { %v677_v19 = vpop.permute.xlu1 %676  ;;  %v679_v21 = vpop.permute.xlu0 %678  ;;  %v996_v11 = vld [vmem:[%s1710_s2 + $0x30] sm:$0xff]  ;;  %v998_v12 = vld [vmem:[%s1710_s2 + $0x40] sm:$0xff] }
 0x17c   : > { %v674_v25 = vadd.f32 %v672_v16, %v662_v13  ;;  %v675_v26 = vadd.f32 %v673_v18, %v663_v14  ;;  %v680_v27 = vsel %vm1723_vm15, %v677_v19, %v679_v21  ;;  %v681_v32 = vsel %vm1723_vm15, %v679_v21, %v677_v19  ;;  %vm1448_vm15 = vmand %vm1728_vm7, %vm1727_vm13  ;;  %v497_v19 = vld [vmem:[%s1713_s5 + $0x8] sm:$0xff] }
 0x17d   : > { %v682_v35 = vsel %vm1725_vm6, %v680_v27, 0.0  ;;  %v683_v36 = vsel %vm1727_vm13, %v681_v32, 0.0  ;;  %v687_v46 = vmax.f32 %v665_v33, %v681_v32  ;;  %vm1457_vm6 = vcmp.eq.s32.totalorder %v287_v23, 0  ;;  %v991_v21 = vld [vmem:[%s1710_s2 + $0x8] sm:$0xff]  ;;  %v993_v23 = vld [vmem:[%s1710_s2 + $0x18] sm:$0xff] }
 0x17e   : > { %v684_v49 = vadd.f32 %v682_v35, %v674_v25  ;;  %v685_v50 = vadd.f32 %v683_v36, %v675_v26  ;;  %vm288_vm13 = vcmp.eq.s32.totalorder %v286_v40, 0  ;;  %v686_v55 = vmax.f32 %v664_v43, %v680_v27  ;;  %vm291_vm7 = vmand %vm1452_vm1, %vm1457_vm6  ;;  %v997_v25 = vld [vmem:[%s1710_s2 + $0x38] sm:$0xff] }
 0x17f   : > { %v689_v44 = vpop.permute.xlu1 %688  ;;  %v691_v45 = vpop.permute.xlu0 %690  ;;  %vm780_vm1 = vcmask 27648  }
 0x180   : > { %v692_v51 = vsel %vm1729_vm3, %v689_v44, %v691_v45  ;;  %v693_v52 = vsel %vm1729_vm3, %v691_v45, %v689_v44  ;;  %vm290_vm3 = vmand %vm1461_vm5, %vm288_vm13  ;;  %vm1766_vm5 = vcmp.lt.s32.totalorder %v1296_v22, 16  ;;  %vm1772_vm13 = vcmp.lt.s32.totalorder %v1296_v22, 1 }
 0x181   : > { %v694_v17 = vsel %vm1439_vm4, %v692_v51, 0.0  ;;  %v695_v53 = vsel %vm1448_vm15, %v693_v52, 0.0  ;;  %v699_v54 = vmax.f32 %v687_v46, %v693_v52  ;;  %v698_v59 = vmax.f32 %v686_v55, %v692_v51  ;;  %vm1767_vm6 = vmmov %vm1766_vm5 }
 0x182   : > { %v696_v56 = vadd.f32 %v694_v17, %v684_v49  ;;  %v697_v57 = vadd.f32 %v695_v53, %v685_v50 }
 0x183   : > { %v707_v58 = vrot.slane %v699_v54, 4  ;;  %v706_v62 = vrot.slane %v698_v59, 4 }
 0x184   : > { %v701_v60 = vmul.f32 0.11111111, %v697_v57  ;;  %v700_v61 = vmul.f32 0.11111111, %v696_v56 }
 0x185   : > { %774 = vmatprep.mubr.f32.mxu1 %v707_v58 }
 0x186   : > { %1001 = vmatprep.subr.msk.mxu1 %vm291_vm7, %v701_v60  ;;  %vm1768_vm7 = vcmp.lt.s32.totalorder %v1296_v22, 15 }
 0x187   : > { %1002 = vmatpush1.xpose.msk.msra.mxu1 %vm290_vm3, %v700_v61  ;;  %vm795_vm3 = vcmask 31744  }
 0x18a   : > { %775 = vmatmul.mubr.f32.vlgmr.msra.gmra.mxu1 %v706_v62 }
 0x18b   : > { %870 = vmatprep.mubr.f32.mxu1 %v1146_v1  ;;  %v300_v1 = vld [vmem:[%s1711_s3] sm:$0xff] }
 0x239   : > { %v587_v40 = vpop.f32.mrf.mxu0 }
 0x23b   : > { %v589_v43 = vpop.f32.mrf.mxu0 }
 0x24a   : > { %v776_v0 = vpop.f32.mrf.mxu1 }
 0x24b   : > { %v781_v2 = vsel %vm780_vm1, %v776_v0, -inf }
 0x24c   : > { %782 = vmax.xlane.f32.xlu1 %v781_v2  ;;  %v778_v3 = vpop.f32.mrf.mxu1 }
 0x25d   : > { %320 = vperm.xlu1 %1067, %v317_v5  }
 0x261   : > { %303 = vperm.xlu1 %1067, %v300_v1  }
 0x265   : > { %306 = vrot.lane.b32.xlu1 %v1496_v6, %s1149_s19 }
 0x269   : > { %362 = vperm.xlu1 %1067, %v992_v7  }
 0x26d   : > { %329 = vrot.lane.b32.xlu1 %v1503_v9, %s1148_s18 }
 0x271   : > { %347 = vrot.lane.b32.xlu1 %v1496_v6, %s1150_s20 }
 0x275   : > { %393 = vperm.xlu1 %1067, %v994_v10  }
 0x279   : > { %371 = vrot.lane.b32.xlu1 %v1503_v9, %s1151_s26 }
 0x27d   : > { %435 = vperm.xlu1 %1067, %v996_v11  }
 0x281   : > { %402 = vrot.lane.b32.xlu1 %v1503_v9, %s1762_s29 }
 0x285   : > { %420 = vrot.lane.b32.xlu1 %v1496_v6, %s1763_s9 }
 0x289   : > { %477 = vperm.xlu1 %1067, %v998_v12  }
 0x28d   : > { %444 = vrot.lane.b32.xlu1 %v1503_v9, %s1764_s17 }
 0x291   : > { %464 = vrot.lane.b32.xlu1 %v1503_v9, %s1765_s13 }
 0x2d5   : > { %v783_v13 = vpop.xlane.xlu1 %782 }
 0x2d6   : > { %v784_v14 = vsub.f32 %v776_v0, %v783_v13 }
 0x2d8   : > { %v785_v15 = vmul.f32 1.442695, %v784_v14 }
 0x2d9   : > { %v321_v26 = vpop.permute.xlu1 %320 }
 0x2da   : > { %1072 = vpow2.f32 %v785_v15 }
 0x2dd   : > { %v1563_v27 = vpop.permute.xlu1 %303 }
 0x2e1   : > { %v307_v32 = vpop.permute.xlu1 %306 }
 0x2e5   : > { %v1565_v33 = vpop.permute.xlu1 %362 }
 0x2e7   : > { %v1528_v16 = vpop.eup %1072 }
 0x2e8   : > { %v787_v18 = vsel %vm780_vm1, %v1528_v16, 0.0  ;;  %vm1773_vm1 = vmmov %vm1772_vm13 }
 0x2e9   : > { %788 = vadd.xlane.f32.xlu0 %v787_v18  ;;  %v330_v35 = vpop.permute.xlu1 %329 }
 0x2ed   : > { %v348_v42 = vpop.permute.xlu1 %347 }
 0x2f1   : > { %v1567_v50 = vpop.permute.xlu1 %393 }
 0x2f5   : > { %v372_v17 = vpop.permute.xlu1 %371 }
 0x2f9   : > { %v1569_v57 = vpop.permute.xlu1 %435 }
 0x2fd   : > { %v403_v10 = vpop.permute.xlu1 %402 }
 0x2ff   : > { %505 = vperm.xlu0 %1066, %v497_v19  }
 0x303   : > { %340 = vperm.xlu0 %1066, %v991_v21  }
 0x307   : > { %308 = vrot.lane.b32.xlu0 %v1503_v9, %s1149_s19 }
 0x30b   : > { %327 = vrot.lane.b32.xlu0 %v1496_v6, %s1148_s18 }
 0x30f   : > { %382 = vperm.xlu0 %1066, %v993_v23   ;;  %v421_v23 = vpop.permute.xlu1 %420 }
 0x313   : > { %349 = vrot.lane.b32.xlu0 %v1503_v9, %s1150_s20  ;;  %s257_s20 = sand.u32 1, %s1136_s22  }
 0x317   : > { %369 = vrot.lane.b32.xlu0 %v1496_v6, %s1151_s26  ;;  %s986_s26 = sshll.u32 %s257_s20, 5 }
 0x31b   : > { %413 = vperm.xlu0 %1066, %v995_v24  }
 0x31f   : > { %400 = vrot.lane.b32.xlu0 %v1496_v6, %s1762_s29  ;;  %s259_s29 = scalar_lea.vmem [#allocation2], %s986_s26 }
 0x323   : > { %455 = vperm.xlu0 %1066, %v997_v25  }
 0x327   : > { %422 = vrot.lane.b32.xlu0 %v1503_v9, %s1763_s9  ;;  %s908_s9 = sshll.u32 %s259_s29, 4  ;;  %s1659_s9 = int_to_ptr.vmem [resolvable:$true] %s908_s9 }
 0x328   : > { %s1084_s28 = scalar_lea.vmem %s1659_s9, 512  ;;  %p1091_p0 = scmp.lt.s32.totalorder %s1659_s9, %s1089_s16 }
 0x329   : > { %p1085_p11 = scmp.ne.s32.totalorder %s1659_s9, %s1084_s28  ;;  %p1092_p1 = scmp.lt.s32.totalorder %s1090_s14, %s1084_s28 }
 0x32b   : > { %442 = vrot.lane.b32.xlu0 %v1496_v6, %s1764_s17  ;;  %s1015_s17 = sshll.u32 %s1214_s25, 9  ;;  %s1667_s25 = scalar_lea.sflag [#allocation3], %s257_s20 }
 0x32c   : > { %s1664_s10 = scalar_lea.hbm %s1714_s6, %s1015_s17  ;;  %p1086_p12 = pnand %p1085_p11, %p1231_p5 }
 0x32d   : > { %p1093_p2 = por %p1092_p1, %p1091_p0 }
 0x32e   : > { %p1087_p13 = pneg %p1086_p12 }
 0x32f   : > { %462 = vrot.lane.b32.xlu0 %v1496_v6, %s1765_s13 }
 0x330   : > { %p1094_p3 = pnand %p1093_p2, %p1087_p13 }
 0x372   : > { %v789_v36 = vpop.xlane.xlu0 %788 }
 0x373   : > { %1074 = vrcp.f32 %v789_v36 }
 0x37a   : > { %v506_v44 = vpop.permute.xlu0 %505 }
 0x37b   : > { %v588_v45 = vadd.f32 %v587_v40, %v506_v44  ;;  %v590_v46 = vadd.f32 %v589_v43, %v506_v44 }
 0x37d   : > { %v598_v47 = vmul.f32 0.70710677, %v588_v45  ;;  %v599_v48 = vmul.f32 0.70710677, %v590_v46  ;;  %v594_v60 = vmul.f32 0.5, %v588_v45  ;;  %v595_v63 = vmul.f32 0.5, %v590_v46 }
 0x37e   : > { %v341_v49 = vpop.permute.xlu0 %340 }
 0x37f   : > { %1076 = verf.f32 %v598_v47 }
 0x380   : > { %1078 = verf.f32 %v599_v48  ;;  %v1075_v52 = vpop.eup %1074 }
 0x381   : > { %v791_v53 = vmul.f32 %v1075_v52, %v789_v36 }
 0x382   : > { %v309_v51 = vpop.permute.xlu0 %308 }
 0x383   : > { %v792_v55 = vsub.f32 2.0, %v791_v53  ;;  %v311_v1 = vsel %vm310_vm9, %v307_v32, %v309_v51  ;;  %v312_v7 = vsel %vm310_vm9, %v309_v51, %v307_v32  ;;  %vm1769_vm9 = vmmov %vm1768_vm7  ;;  %v478_v51 = vpop.permute.xlu1 %477 }
 0x384   : > { %v315_v13 = vsel %vm1322_vm10, %v312_v7, 0.0  ;;  %v316_v14 = vsel %vm1334_vm11, %v311_v1, 0.0  ;;  %vm1770_vm10 = vcmp.ne.s32.totalorder %v1300_v28, 0  ;;  %vm1771_vm11 = vcmp.ne.s32.totalorder %v1305_v30, 0 }
 0x385   : > { %v793_v62 = vmul.f32 %v1075_v52, %v792_v55  ;;  %v324_v19 = vmul.f32 %v321_v26, %v316_v14 }
 0x386   : > { %v328_v54 = vpop.permute.xlu0 %327 }
 0x387   : > { %v794_v11 = vmul.f32 %v1528_v16, %v793_v62  ;;  %v332_v15 = vsel %vm1766_vm5, %v328_v54, %v330_v35  ;;  %v333_v18 = vsel %vm1767_vm6, %v330_v35, %v328_v54  ;;  %v323_v16 = vmul.f32 %v321_v26, %v315_v13 }
 0x388   : > { %v334_v24 = vsel %vm1770_vm10, %v333_v18, 0.0  ;;  %v335_v25 = vsel %vm1771_vm11, %v332_v15, 0.0  ;;  %vm1775_vm5 = vcmp.ne.s32.totalorder %v1307_v31, 0  ;;  %vm1778_vm6 = vcmp.ne.s32.totalorder %v1303_v29, 15 }
 0x389   : > { %v325_v40 = vadd.f32 %v323_v16, %v1563_v27  ;;  %v343_v43 = vmul.f32 %v341_v49, %v334_v24  ;;  %v344_v44 = vmul.f32 %v341_v49, %v335_v25  ;;  %vm1782_vm11 = vcmp.lt.s32.totalorder %v1296_v22, 112 }
 0x38a   : > { %v383_v56 = vpop.permute.xlu0 %382 }
 0x38b   : > { %v345_v41 = vadd.f32 %v343_v43, %v325_v40 }
 0x38c   : > { %v1077_v58 = vpop.eup %1076 }
 0x38d   : > { %v1079_v59 = vpop.eup %1078  ;;  %v606_v61 = vadd.f32 1.0, %v1077_v58 }
 0x38e   : > { %v607_v0 = vadd.f32 1.0, %v1079_v59  ;;  %v350_v2 = vpop.permute.xlu0 %349  ;;  %v396_v59 = vmul.f32 %v1567_v50, %v1496_v6 }
 0x38f   : > { %v1571_v3 = vmul.f32 %v606_v61, %v594_v60  ;;  %v352_v21 = vsel %vm1768_vm7, %v348_v42, %v350_v2  ;;  %v353_v34 = vsel %vm1769_vm9, %v350_v2, %v348_v42  ;;  %v326_v42 = vadd.f32 %v324_v19, %v1563_v27 }
 0x390   : > { %v1573_v5 = vmul.f32 %v607_v0, %v595_v63  ;;  %v356_v35 = vsel %vm1342_vm12, %v353_v34, 0.0  ;;  %v357_v36 = vsel %vm1351_vm14, %v352_v21, 0.0  ;;  %vm1776_vm12 = vcmp.lt.s32.totalorder %v1296_v22, 127  ;;  %v445_v0 = vpop.permute.xlu1 %444 }
 0x391   : > { %v365_v48 = vmul.f32 %v1565_v33, %v356_v35  ;;  %v366_v38 = vmul.f32 %v1565_v33, %v357_v36  ;;  %v346_v52 = vadd.f32 %v344_v44, %v326_v42  ;;  %vm1777_vm14 = vmmov %vm1776_vm12  ;;  %v397_v33 = vmul.f32 %v1567_v50, %v1503_v9 }
 0x392   : > { %1003 = vmatprep.subr.msk.mxu1 %vm799_vm0, %v1573_v5  ;;  %v370_v12 = vpop.permute.xlu0 %369  ;;  %vm1779_vm7 = vcmp.ne.s32.totalorder %v1307_v31, 15  ;;  %vm1780_vm9 = vcmp.lt.s32.totalorder %v1296_v22, 113 }
 0x393   : > { %1004 = vmatpush1.msk.msra.mxu1 %vm799_vm0, %v1571_v3  ;;  %v374_v32 = vsel %vm1772_vm13, %v370_v12, %v372_v17  ;;  %v375_v26 = vsel %vm1773_vm1, %v372_v17, %v370_v12  ;;  %v367_v55 = vadd.f32 %v365_v48, %v345_v41  ;;  %v368_v58 = vadd.f32 %v366_v38, %v346_v52  ;;  %vm1781_vm10 = vmmov %vm1780_vm9 }
 0x394   : > { %1005 = vmatmul.mubr.msk.f32.vlgmr.msra.gmra.mxu1 %vm795_vm3, %v794_v11  ;;  %vm1774_vm3 = vcmp.ne.s32.totalorder %v1303_v29, 0  ;;  %v377_v47 = vsel %vm1775_vm5, %v374_v32, 0.0  ;;  %vm1783_vm13 = vmmov %vm1782_vm11  ;;  %v465_v15 = vpop.permute.xlu1 %464  ;;  %vm1786_vm1 = vcmp.lt.s32.totalorder %v1296_v22, 111 }
 0x395   : > { %v376_v46 = vsel %vm1774_vm3, %v375_v26, 0.0  ;;  %v386_v53 = vmul.f32 %v383_v56, %v377_v47  ;;  %vm1787_vm3 = vmmov %vm1786_vm1 }
 0x396   : > { %v414_v37 = vpop.permute.xlu0 %413  ;;  %v385_v17 = vmul.f32 %v383_v56, %v376_v46 }
 0x397   : > { %v388_v61 = vadd.f32 %v386_v53, %v368_v58 }
 0x398   : > { %v387_v60 = vadd.f32 %v385_v17, %v367_v55  ;;  %v878_v17 = vrot.slane %v1573_v5, 4 }
 0x39a   : > { %v401_v45 = vpop.permute.xlu0 %400  ;;  %v398_v7 = vadd.f32 %v396_v59, %v387_v60 }
 0x39b   : > { %v405_v27 = vsel %vm1776_vm12, %v401_v45, %v403_v10  ;;  %v406_v49 = vsel %vm1777_vm14, %v403_v10, %v401_v45  ;;  %v399_v10 = vadd.f32 %v397_v33, %v388_v61 }
 0x39c   : > { %v407_v56 = vsel %vm1778_vm6, %v405_v27, 0.0  ;;  %v408_v62 = vsel %vm1779_vm7, %v406_v49, 0.0 }
 0x39d   : > { %v416_v50 = vmul.f32 %v414_v37, %v407_v56  ;;  %v417_v29 = vmul.f32 %v414_v37, %v408_v62 }
 0x39e   : > { %v456_v54 = vpop.permute.xlu0 %455 }
 0x39f   : > { %v418_v18 = vadd.f32 %v416_v50, %v398_v7  ;;  %v419_v16 = vadd.f32 %v417_v29, %v399_v10 }
 0x3a2   : > { %v423_v63 = vpop.permute.xlu0 %422 }
 0x3a3   : > { %v425_v2 = vsel %vm1780_vm9, %v421_v23, %v423_v63  ;;  %v426_v1 = vsel %vm1781_vm10, %v423_v63, %v421_v23 }
 0x3a4   : > { %v429_v6 = vsel %vm1395_vm8, %v425_v2, 0.0  ;;  %v430_v9 = vsel %vm1405_vm2, %v426_v1, 0.0  ;;  %vm1784_vm8 = vcmp.ne.s32.totalorder %v1300_v28, 15  ;;  %vm1785_vm2 = vcmp.ne.s32.totalorder %v1305_v30, 15 }
 0x3a5   : > { %v438_v11 = vmul.f32 %v1569_v57, %v429_v6  ;;  %v439_v12 = vmul.f32 %v1569_v57, %v430_v9 }
 0x3a6   : > { %v443_v31 = vpop.permute.xlu0 %442 }
 0x3a7   : > { %v447_v13 = vsel %vm1782_vm11, %v443_v31, %v445_v0  ;;  %v448_v14 = vsel %vm1783_vm13, %v445_v0, %v443_v31  ;;  %v440_v37 = vadd.f32 %v438_v11, %v418_v18  ;;  %v441_v57 = vadd.f32 %v439_v12, %v419_v16 }
 0x3a8   : > { %v449_v4 = vsel %vm1784_vm8, %v447_v13, 0.0  ;;  %v450_v8 = vsel %vm1785_vm2, %v448_v14, 0.0 }
 0x3a9   : > { %v458_v19 = vmul.f32 %v456_v54, %v449_v4  ;;  %v459_v21 = vmul.f32 %v456_v54, %v450_v8 }
 0x3aa   : > { %v463_v34 = vpop.permute.xlu0 %462 }
 0x3ab   : > { %v467_v23 = vsel %vm1786_vm1, %v463_v34, %v465_v15  ;;  %v468_v24 = vsel %vm1787_vm3, %v465_v15, %v463_v34  ;;  %v460_v25 = vadd.f32 %v458_v19, %v440_v37  ;;  %v461_v32 = vadd.f32 %v459_v21, %v441_v57 }
 0x3ac   : > { %v471_v28 = vsel %vm1439_vm4, %v467_v23, 0.0  ;;  %v472_v30 = vsel %vm1448_vm15, %v468_v24, 0.0 }
 0x3ad   : > { %v480_v26 = vmul.f32 %v478_v51, %v471_v28  ;;  %v481_v35 = vmul.f32 %v478_v51, %v472_v30  ;;  %v877_v51 = vrot.slane %v1571_v3, 4 }
 0x3af   : > { %v482_v36 = vadd.f32 %v480_v26, %v460_v25  ;;  %v483_v40 = vadd.f32 %v481_v35, %v461_v32 }
 0x3b1   : > { %v486_v42 = vmul.f32 0.70710677, %v482_v36  ;;  %v487_v43 = vmul.f32 0.70710677, %v483_v40  ;;  %v484_v39 = vmul.f32 0.5, %v482_v36  ;;  %v485_v46 = vmul.f32 0.5, %v483_v40 }
 0x3b3   : > { %1080 = verf.f32 %v486_v42 }
 0x3b4   : > { %1082 = verf.f32 %v487_v43 }
 0x3c0   : > { %v1081_v22 = vpop.eup %1080 }
 0x3c1   : > { %v1083_v44 = vpop.eup %1082  ;;  %v490_v45 = vadd.f32 1.0, %v1081_v22 }
 0x3c2   : > { %v491_v20 = vadd.f32 1.0, %v1083_v44 }
 0x3c3   : > { %v492_v47 = vmul.f32 %v490_v45, %v484_v39 }
 0x3c4   : > { %v493_v48 = vmul.f32 %v491_v20, %v485_v46 }
 0x3c5   : > { %889 = vst [vmem:[%s259_s29] sm:$0xff] %v492_v47 }
 0x3c6   : > { %890 = vst [vmem:[%s259_s29 + $0x8] sm:$0xff] %v493_v48 }
 0x454   : > { %v872_v38 = vpop.f32.mrf.mxu1 }
 0x455   : > { %v883_v41 = vrot.slane %v872_v38, 4 }
 0x456   : > { %v874_v52 = vpop.f32.mrf.mxu1 }
 0x457   : > { %v887_v53 = vsel %vm799_vm0, %v877_v51, %v883_v41  ;;  %v884_v54 = vrot.slane %v874_v52, 4 }
 0x458   : > { %891 = vst [vmem:[%s259_s29 + $0x10] sm:$0xff] %v887_v53 }
 0x459   : > { %v888_v3 = vsel %vm799_vm0, %v878_v17, %v884_v54 }
 0x45a   : > { %892 = vst [vmem:[%s259_s29 + $0x18] sm:$0xff] %v888_v3 }
 0x45b   : > { %1097 = shalt.err (!%p1094_p3)
}
 0x45c   : > { %s1098_s19 = scalar_lea.hbm %s1664_s10, 512  ;;  %s1102_s26 = scalar_lea.hbm %s1714_s6, 1024 }
 0x45d   : > { %p1099_p4 = scmp.ne.s32.totalorder %s1664_s10, %s1098_s19  ;;  %p1103_p9 = scmp.lt.s32.totalorder %s1664_s10, %s1714_s6 }
 0x45e   : > { %p1104_p10 = scmp.lt.s32.totalorder %s1102_s26, %s1098_s19 }
 0x45f   : > { %p1100_p7 = pnand %p1099_p4, %p1231_p5 }
 0x460   : > { %p1105_p11 = por %p1104_p10, %p1103_p9 }
 0x461   : > { %p1101_p8 = pneg %p1100_p7 }
 0x463   : > { %p1106_p12 = pnand %p1105_p11, %p1101_p8 }
 0x465   : > { %1109 = shalt.err (!%p1106_p12)
}
 0x466   : > { %s1157_s13 = smov 256  }
 0x467   : > { %1016 = dma.vmem_to_hbm [thread:$0]  (%p1231_p5), %s1659_s9, 512, %s1664_s10, %s1667_s25, %s1157_s13, %s1157_s13, %s1148_s18  }
 0x468 PF: > { %p1022_p13 = scmp.ge.s32.totalorder %s1144_s24, 2  ;;  %s923_s12 = sand.u32 1, %s1132_s21  }
 0x469   : > { %s924_s28 = scalar_lea.sflag [#allocation3], %s923_s12 }
 0x46a   : > { %p1019_p0 = pnand %p1022_p13, %p1235_p6 }
 0x46c   : > { %p1020_p1 = pneg %p1019_p0 }
 0x46e   : > { %1127 = dma.done.wait (%p1020_p1), %s924_s28, 512  }
 0x46f   : > { %1129 = vsyncadd (%p1020_p1), %s924_s28, 4294966784  ;;  %p16_p2 = scmp.ge.s32.totalorder %s1218_s27, 4   ;;  %s1788_s21 = smov %s1136_s22 }
 0x470   : > { %s1789_s22 = smov %s1140_s23  ;;  %s1790_s23 = smov %s1229_s30 }
 0x471   : > { %s1791_s24 = smov %s1218_s27  ;;  %18 = sbr.rel (!%p16_p2) target bundleno = 3 (0x3), region = 90 }
 0x476   :  { %929 = vsyncpa [#allocation3], 1 }
 0x477   :  { %931 = vsyncpa [#allocation3 + $0x1], 1 }

</bundles_post_ra>
